<compile_context>
chip_gen: v5e
topology: v5e:2x2
jax: 0.10.0
libtpu: 0.0.40
codegen_flags: <defaults>
</compile_context>

<pallas_src>
from math import sqrt

import jax
import jax.numpy as jnp
from jax.experimental import pallas as pl
from jax.experimental.pallas import tpu as pltpu

# Layer salts (arbitrary odd-ish constants) to decorrelate the two dropout masks.
_SALT_L1 = 0x243F6A88
_SALT_L2 = 0x3C6EF372


def _round_up(v, m):
    return (v + m - 1) // m * m


def _keep_mask(seed_i32, row_offset_i32, shape, salt):
    """Bernoulli(0.5) keep-mask from a stateless 32-bit hash.

    Depends only on (seed, global row, column, salt), so the mask is identical
    for any row tiling.  Pure integer VPU ops -> portable (TPU + interpret).
    """
    rows = (jax.lax.broadcasted_iota(jnp.int32, shape, 0)
            + row_offset_i32).astype(jnp.uint32)
    cols = jax.lax.broadcasted_iota(jnp.int32, shape, 1).astype(jnp.uint32)
    h = seed_i32.astype(jnp.uint32) ^ jnp.uint32(salt)
    h = h + rows * jnp.uint32(0x9E3779B1) + cols * jnp.uint32(0x85EBCA77)
    # murmur3 fmix32 finalizer
    h = h ^ (h >> 16)
    h = h * jnp.uint32(0x85EBCA6B)
    h = h ^ (h >> 13)
    h = h * jnp.uint32(0xC2B2AE35)
    h = h ^ (h >> 16)
    # use the (well-mixed) top bit rather than the low bit
    return (h & jnp.uint32(0x80000000)) == jnp.uint32(0)


def _prenet_fused_kernel(seed_ref, x_ref, w1_ref, w2_ref, o_ref):
    """matmul1 -> ReLU -> dropout(0.5) -> matmul2 -> ReLU -> dropout(0.5).

    Both layers fused; the intermediate activation never leaves VMEM/vregs.
    The 2x inverse-dropout scales are folded into w2 (wrapper), so dropout
    here is a plain select.
    """
    tile_m = x_ref.shape[0]
    seed = seed_ref[0]
    row0 = pl.program_id(0) * tile_m          # global row offset of this tile

    x = x_ref[...]

    # ---- layer 1: bias-free linear on the MXU (f32 accumulation) ----
    y = jnp.dot(x, w1_ref[...], preferred_element_type=jnp.float32)
    y = jnp.maximum(y, 0.0)                                    # ReLU (VPU)
    y = jnp.where(_keep_mask(seed, row0, y.shape, _SALT_L1), y, 0.0)

    # ---- layer 2 (w2 pre-scaled by 4 in the wrapper) ----
    z = jnp.dot(y, w2_ref[...], preferred_element_type=jnp.float32)
    z = jnp.maximum(z, 0.0)
    z = jnp.where(_keep_mask(seed, row0, z.shape, _SALT_L2), z, 0.0)

    o_ref[...] = z.astype(o_ref.dtype)


def init_prenet_params(key, in_dim, sizes):
    """Xavier-uniform init matching LinearNorm shapes.

    PyTorch LinearNorm weight is (out, in); we store the transpose (in, out)
    so the kernel computes x @ W directly.
    """
    in_sizes = [in_dim] + sizes[:-1]
    params = []
    for i, (ins, outs) in enumerate(zip(in_sizes, sizes)):
        k = jax.random.fold_in(key, i)
        limit = sqrt(6.0 / (ins + outs))  # gain=1 (linear)
        params.append(jax.random.uniform(k, (ins, outs), jnp.float32, -limit, limit))
    return params


def _seed_from_key(dropout_key):
    return jax.random.randint(dropout_key, (1,), 0,
                              jnp.iinfo(jnp.int32).max, dtype=jnp.int32)


def prenet_forward(x, params, dropout_key, *, tile_m_max=1024):
    """x: (B, T, in_dim) -> (B, T, sizes[-1]), dtype preserved."""
    assert len(params) == 2, "Decoder Prenet has exactly two layers"
    w1, w2 = params
    b, t, d_in = x.shape
    assert w1.shape[0] == d_in
    d_mid = w1.shape[1]
    assert w2.shape[0] == d_mid
    d_out = w2.shape[1]

    n = b * t
    h = x.reshape(n, d_in)                    # contiguous reshape, no HBM pass

    # Fold BOTH layers' 2.0 inverse-dropout scales into w2 (exact: power of
    # two, and relu(4*a) == 4*relu(a)).  Tiny array, negligible cost.
    w2s = w2 * jnp.asarray(4.0, w2.dtype)

    # Balanced row tiling; force >= 2 grid steps when possible so both v7x
    # TensorCores are used ("parallel" axis).  tile_m is a multiple of 8; a
    # non-dividing last tile is handled by Pallas (masked writes), so neither
    # x nor the output needs any padding.
    n_tiles = max(1, -(-n // tile_m_max))
    if n_tiles == 1 and n > 8:
        n_tiles = 2
    tile_m = _round_up(-(-n // n_tiles), 8)
    grid = (-(-n // tile_m),)

    seed = _seed_from_key(dropout_key)        # lands in SMEM via scalar prefetch

    grid_spec = pltpu.PrefetchScalarGridSpec(
        num_scalar_prefetch=1,
        grid=grid,
        in_specs=[
            pl.BlockSpec((tile_m, d_in), lambda i, seed_ref: (i, 0)),   # x tile
            pl.BlockSpec((d_in, d_mid), lambda i, seed_ref: (0, 0)),    # w1 resident
            pl.BlockSpec((d_mid, d_out), lambda i, seed_ref: (0, 0)),   # w2 resident
        ],
        out_specs=pl.BlockSpec((tile_m, d_out), lambda i, seed_ref: (i, 0)),
    )

    # VMEM need is only a few MiB (double-buffered row tiles + tiny weights +
    # intermediate), well under the default scoped-VMEM limit on v5e/v6e/v7x,
    # so we intentionally do NOT set vmem_limit_bytes.
    out = pl.pallas_call(
        _prenet_fused_kernel,
        out_shape=jax.ShapeDtypeStruct((n, d_out), x.dtype),
        grid_spec=grid_spec,
        compiler_params=pltpu.CompilerParams(
            dimension_semantics=("parallel",),   # row tiles independent
        ),
    )(seed, h, w1, w2s)

    return out.reshape(b, t, d_out)


def prenet_reference(x, params, dropout_key):
    """Pure-JAX reference with the identical (stateless) dropout mask."""
    w1, w2 = params
    b, t, d_in = x.shape
    n = b * t
    seed = _seed_from_key(dropout_key)[0]
    hx = x.reshape(n, d_in).astype(jnp.float32)
    zero_off = jnp.int32(0)

    y = jnp.maximum(jnp.dot(hx, w1, precision=jax.lax.Precision.HIGHEST), 0.0)
    y = jnp.where(_keep_mask(seed, zero_off, y.shape, _SALT_L1), y * 2.0, 0.0)
    z = jnp.maximum(jnp.dot(y, w2, precision=jax.lax.Precision.HIGHEST), 0.0)
    z = jnp.where(_keep_mask(seed, zero_off, z.shape, _SALT_L2), z * 2.0, 0.0)
    return z.reshape(b, t, -1).astype(x.dtype)


if __name__ == "__main__":
    key = jax.random.PRNGKey(0)
    k_x, k_w, k_drop = jax.random.split(key, 3)

    # Small shapes consistent with the module: batch=2, seq=8,
    # in_dim = n_mel_channels * n_frames_per_step = 32, prenet sizes [32, 32].
    B, T, IN_DIM = 2, 8, 32
    SIZES = [32, 32]

    x = jax.random.normal(k_x, (B, T, IN_DIM), dtype=jnp.float32)
    params = init_prenet_params(k_w, IN_DIM, SIZES)

    out = prenet_forward(x, params, k_drop)
    out = jax.block_until_ready(out)

    assert out.shape == (B, T, SIZES[-1]), out.shape
    assert out.dtype == jnp.float32
    # ReLU + dropout (zero or kept) => all entries >= 0.
    assert bool(jnp.all(out >= 0.0))
    # Exact-mask numerical check against a pure-JAX reference.
    ref = prenet_reference(x, params, k_drop)
    assert bool(jnp.allclose(out, ref, rtol=1e-3, atol=1e-3)), "mismatch vs reference"
    print("KERNEL_OK")
</pallas_src>

<mosaic_0001>
module attributes {stable_mosaic.version = 11 : i64} {
  func.func @_prenet_fused_kernel(%arg0: i32, %arg1: memref<1xi32, #tpu.memory_space<smem>>, %arg2: memref<8x32xf32, #tpu.memory_space<vmem>>, %arg3: memref<32x32xf32, #tpu.memory_space<vmem>>, %arg4: memref<32x32xf32, #tpu.memory_space<vmem>>, %arg5: memref<8x32xf32, #tpu.memory_space<vmem>>) attributes {dimension_semantics = [#tpu.dimension_semantics<parallel>], iteration_bounds = array<i64: 2>, scalar_prefetch = 1 : i64, scratch_operands = 0 : i64, tpu.core_type = #tpu.core_type<tc>, window_params = [{transform_indices = @transform_0, window_bounds = array<i64: 8, 32>}, {pipeline_mode = #tpu.pipeline_mode<synchronous>, transform_indices = @transform_1, window_bounds = array<i64: 32, 32>}, {pipeline_mode = #tpu.pipeline_mode<synchronous>, transform_indices = @transform_2, window_bounds = array<i64: 32, 32>}, {transform_indices = @transform_3, window_bounds = array<i64: 8, 32>}]} {
    %c0 = arith.constant 0 : index
    %0 = memref.load %arg1[%c0] : memref<1xi32, #tpu.memory_space<smem>>
    %c8_i32 = arith.constant 8 : i32
    %1 = arith.muli %arg0, %c8_i32 : i32
    %c0_0 = arith.constant 0 : index
    %c0_1 = arith.constant 0 : index
    %2 = vector.load %arg2[%c0_0, %c0_1] : memref<8x32xf32, #tpu.memory_space<vmem>>, vector<8x32xf32>
    %c0_2 = arith.constant 0 : index
    %c0_3 = arith.constant 0 : index
    %3 = vector.load %arg3[%c0_2, %c0_3] : memref<32x32xf32, #tpu.memory_space<vmem>>, vector<32x32xf32>
    %cst = arith.constant dense<0.000000e+00> : vector<8x32xf32>
    %4 = tpu.matmul %2, %3, %cst {dimension_numbers = #tpu.dot_dimension_numbers<[1], [0], [0], [1], [0, 0, 1, 1], [], []>} : vector<8x32xf32>, vector<32x32xf32>, vector<8x32xf32> -> vector<8x32xf32>
    %cst_4 = arith.constant 0.000000e+00 : f32
    %5 = vector.broadcast %cst_4 : f32 to vector<8x32xf32>
    %6 = arith.maximumf %4, %5 : vector<8x32xf32>
    %7 = tpu.iota {dimensions = array<i32: 0>} : vector<8x32xi32>
    %8 = vector.broadcast %1 : i32 to vector<8x32xi32>
    %9 = arith.addi %7, %8 : vector<8x32xi32>
    %10 = tpu.iota {dimensions = array<i32: 1>} : vector<8x32xi32>
    %c608135816_i32 = arith.constant 608135816 : i32
    %11 = arith.xori %0, %c608135816_i32 : i32
    %c-1640531535_i32 = arith.constant -1640531535 : i32
    %12 = vector.broadcast %c-1640531535_i32 : i32 to vector<8x32xi32>
    %13 = arith.muli %9, %12 : vector<8x32xi32>
    %14 = vector.broadcast %11 : i32 to vector<8x32xi32>
    %15 = arith.addi %14, %13 : vector<8x32xi32>
    %c-2048144777_i32 = arith.constant -2048144777 : i32
    %16 = vector.broadcast %c-2048144777_i32 : i32 to vector<8x32xi32>
    %17 = arith.muli %10, %16 : vector<8x32xi32>
    %18 = arith.addi %15, %17 : vector<8x32xi32>
    %c16_i32 = arith.constant 16 : i32
    %19 = vector.broadcast %c16_i32 : i32 to vector<8x32xi32>
    %20 = arith.shrui %18, %19 : vector<8x32xi32>
    %21 = arith.xori %18, %20 : vector<8x32xi32>
    %c-2048144789_i32 = arith.constant -2048144789 : i32
    %22 = vector.broadcast %c-2048144789_i32 : i32 to vector<8x32xi32>
    %23 = arith.muli %21, %22 : vector<8x32xi32>
    %c13_i32 = arith.constant 13 : i32
    %24 = vector.broadcast %c13_i32 : i32 to vector<8x32xi32>
    %25 = arith.shrui %23, %24 : vector<8x32xi32>
    %26 = arith.xori %23, %25 : vector<8x32xi32>
    %c-1028477387_i32 = arith.constant -1028477387 : i32
    %27 = vector.broadcast %c-1028477387_i32 : i32 to vector<8x32xi32>
    %28 = arith.muli %26, %27 : vector<8x32xi32>
    %c16_i32_5 = arith.constant 16 : i32
    %29 = vector.broadcast %c16_i32_5 : i32 to vector<8x32xi32>
    %30 = arith.shrui %28, %29 : vector<8x32xi32>
    %31 = arith.xori %28, %30 : vector<8x32xi32>
    %c-2147483648_i32 = arith.constant -2147483648 : i32
    %32 = vector.broadcast %c-2147483648_i32 : i32 to vector<8x32xi32>
    %33 = arith.andi %31, %32 : vector<8x32xi32>
    %c0_i32 = arith.constant 0 : i32
    %34 = vector.broadcast %c0_i32 : i32 to vector<8x32xi32>
    %35 = arith.cmpi eq, %33, %34 : vector<8x32xi32>
    %cst_6 = arith.constant 0.000000e+00 : f32
    %36 = vector.broadcast %cst_6 : f32 to vector<8x32xf32>
    %37 = arith.select %35, %6, %36 : vector<8x32xi1>, vector<8x32xf32>
    %c0_7 = arith.constant 0 : index
    %c0_8 = arith.constant 0 : index
    %38 = vector.load %arg4[%c0_7, %c0_8] : memref<32x32xf32, #tpu.memory_space<vmem>>, vector<32x32xf32>
    %cst_9 = arith.constant dense<0.000000e+00> : vector<8x32xf32>
    %39 = tpu.matmul %37, %38, %cst_9 {dimension_numbers = #tpu.dot_dimension_numbers<[1], [0], [0], [1], [0, 0, 1, 1], [], []>} : vector<8x32xf32>, vector<32x32xf32>, vector<8x32xf32> -> vector<8x32xf32>
    %cst_10 = arith.constant 0.000000e+00 : f32
    %40 = vector.broadcast %cst_10 : f32 to vector<8x32xf32>
    %41 = arith.maximumf %39, %40 : vector<8x32xf32>
    %42 = tpu.iota {dimensions = array<i32: 0>} : vector<8x32xi32>
    %43 = vector.broadcast %1 : i32 to vector<8x32xi32>
    %44 = arith.addi %42, %43 : vector<8x32xi32>
    %45 = tpu.iota {dimensions = array<i32: 1>} : vector<8x32xi32>
    %c1013904242_i32 = arith.constant 1013904242 : i32
    %46 = arith.xori %0, %c1013904242_i32 : i32
    %c-1640531535_i32_11 = arith.constant -1640531535 : i32
    %47 = vector.broadcast %c-1640531535_i32_11 : i32 to vector<8x32xi32>
    %48 = arith.muli %44, %47 : vector<8x32xi32>
    %49 = vector.broadcast %46 : i32 to vector<8x32xi32>
    %50 = arith.addi %49, %48 : vector<8x32xi32>
    %c-2048144777_i32_12 = arith.constant -2048144777 : i32
    %51 = vector.broadcast %c-2048144777_i32_12 : i32 to vector<8x32xi32>
    %52 = arith.muli %45, %51 : vector<8x32xi32>
    %53 = arith.addi %50, %52 : vector<8x32xi32>
    %c16_i32_13 = arith.constant 16 : i32
    %54 = vector.broadcast %c16_i32_13 : i32 to vector<8x32xi32>
    %55 = arith.shrui %53, %54 : vector<8x32xi32>
    %56 = arith.xori %53, %55 : vector<8x32xi32>
    %c-2048144789_i32_14 = arith.constant -2048144789 : i32
    %57 = vector.broadcast %c-2048144789_i32_14 : i32 to vector<8x32xi32>
    %58 = arith.muli %56, %57 : vector<8x32xi32>
    %c13_i32_15 = arith.constant 13 : i32
    %59 = vector.broadcast %c13_i32_15 : i32 to vector<8x32xi32>
    %60 = arith.shrui %58, %59 : vector<8x32xi32>
    %61 = arith.xori %58, %60 : vector<8x32xi32>
    %c-1028477387_i32_16 = arith.constant -1028477387 : i32
    %62 = vector.broadcast %c-1028477387_i32_16 : i32 to vector<8x32xi32>
    %63 = arith.muli %61, %62 : vector<8x32xi32>
    %c16_i32_17 = arith.constant 16 : i32
    %64 = vector.broadcast %c16_i32_17 : i32 to vector<8x32xi32>
    %65 = arith.shrui %63, %64 : vector<8x32xi32>
    %66 = arith.xori %63, %65 : vector<8x32xi32>
    %c-2147483648_i32_18 = arith.constant -2147483648 : i32
    %67 = vector.broadcast %c-2147483648_i32_18 : i32 to vector<8x32xi32>
    %68 = arith.andi %66, %67 : vector<8x32xi32>
    %c0_i32_19 = arith.constant 0 : i32
    %69 = vector.broadcast %c0_i32_19 : i32 to vector<8x32xi32>
    %70 = arith.cmpi eq, %68, %69 : vector<8x32xi32>
    %cst_20 = arith.constant 0.000000e+00 : f32
    %71 = vector.broadcast %cst_20 : f32 to vector<8x32xf32>
    %72 = arith.select %70, %41, %71 : vector<8x32xi1>, vector<8x32xf32>
    %c0_21 = arith.constant 0 : index
    %c0_22 = arith.constant 0 : index
    %73 = vector.load %arg5[%c0_21, %c0_22] : memref<8x32xf32, #tpu.memory_space<vmem>>, vector<8x32xf32>
    tpu.vector_store %arg5[%c0_21, %c0_22], %72 {strides = array<i32>} : memref<8x32xf32, #tpu.memory_space<vmem>>, vector<8x32xf32>,
    return
  }
  func.func @transform_0(%arg0: i32, %arg1: memref<1xi32, #tpu.memory_space<smem>>) -> (i32, i32) {
    %c0_i32 = arith.constant 0 : i32
    %c0_i32_0 = arith.constant 0 : i32
    return %arg0, %c0_i32 : i32, i32
  }
  func.func @transform_1(%arg0: i32, %arg1: memref<1xi32, #tpu.memory_space<smem>>) -> (i32, i32) {
    %c0_i32 = arith.constant 0 : i32
    %c0_i32_0 = arith.constant 0 : i32
    %c0_i32_1 = arith.constant 0 : i32
    return %c0_i32, %c0_i32_0 : i32, i32
  }
  func.func @transform_2(%arg0: i32, %arg1: memref<1xi32, #tpu.memory_space<smem>>) -> (i32, i32) {
    %c0_i32 = arith.constant 0 : i32
    %c0_i32_0 = arith.constant 0 : i32
    %c0_i32_1 = arith.constant 0 : i32
    return %c0_i32, %c0_i32_0 : i32, i32
  }
  func.func @transform_3(%arg0: i32, %arg1: memref<1xi32, #tpu.memory_space<smem>>) -> (i32, i32) {
    %c0_i32 = arith.constant 0 : i32
    %c0_i32_0 = arith.constant 0 : i32
    return %arg0, %c0_i32 : i32, i32
  }
}

</mosaic_0001>

<bundles_post_ra>
// kernel: tpu_custom_call.1
= control target key start
LH: loop header
LB: loop body
LE: loop exit
PB: predicated region body
PF: predicated region fallthrough
CT: control target
= control target key end

     0   :  { %s869_s0 = inlined_call_operand.<no memory space> [shape: s32[1], index: 0, kind: input, shape index: {}]   ;;  %s870_s1 = inlined_call_operand.hbm [shape: f32[16,32], index: 1, kind: input, shape index: {}]   ;;  %s871_s2 = inlined_call_operand.hbm [shape: f32[32,32], index: 2, kind: input, shape index: {}]   ;;  %s872_s3 = inlined_call_operand.hbm [shape: f32[32,32], index: 3, kind: input, shape index: {}]   ;;  %s873_s4 = inlined_call_operand.hbm [shape: f32[16,32], index: 4, kind: output, shape index: {}]  }
   0x1   :  { %9 = sst [smem:[#allocation3]] %s869_s0 }
   0x2   :  { %10 = vsyncpa [#allocation5], 0 }
   0x3   :  { %12 = vsyncpa [#allocation5 + $0x1], 0 }
   0x4   :  { %13 = vsyncpa [#allocation8], 0 }
   0x5   :  { %14 = vsyncpa [#allocation6], 0 }
   0x6   :  { %16 = vsyncpa [#allocation6 + $0x1], 0  ;;  %s709_s17 = smov 0   ;;  %s711_s18 = smov 0  }
   0x7   :  { %s713_s19 = smov 0   ;;  %s715_s20 = smov 0  }
   0x8 LB: > { %s132_s22 = sshll.u32 %s871_s2, 4  ;;  %s733_s23 = sadd.s32 4294967295, %s675_s20   ;;  %s675_s20 = sphi %s715_s20, %s884_s20   ;;  %s671_s19 = sphi %s713_s19, %s883_s19   ;;  %s667_s18 = sphi %s711_s18, %s882_s18   ;;  %s663_s17 = sphi %s709_s17, %s881_s17   ;;  %s133_s22 = int_to_ptr.hbm [resolvable:$true] %s132_s22 }
   0x9   : > { %p428_p0 = scmp.ge.s32.totalorder %s675_s20, 1  ;;  %p43_p1 = scmp.eq.s32.totalorder %s733_s23, 0 }
   0xa   : > { %p121_p2 = scmp.lt.s32.totalorder %s675_s20, 3  ;;  %s677_s25 = smov [#allocation7]  }
   0xb   : > { %s134_s26 = sshll.u32 %s677_s25, 4  ;;  %s146_s29 = sshll.u32 %s872_s3, 4  ;;  %s135_s26 = int_to_ptr.vmem [resolvable:$true] %s134_s26  ;;  %s147_s29 = int_to_ptr.hbm [resolvable:$true] %s146_s29 }
   0xc   : > { %p738_p3 = pnand %p428_p0, %p121_p2  ;;  %s678_s30 = smov [#allocation9]  }
   0xd   : > { %s148_s5 = sshll.u32 %s678_s30, 4  ;;  %s679_s6 = smov 128   ;;  %s149_s5 = int_to_ptr.vmem [resolvable:$true] %s148_s5 }
   0xe   : > { %p458_p4 = pneg %p738_p3  ;;  %s680_s7 = smov 8  }
   0xf   : > { %s427_s8 = sadd.s32 4294967294, %s675_s20   ;;  %s752_s9 = sadd.s32 1, %s675_s20  }
  0x10   : > { %p459_p6 = pnand %p458_p4, %p43_p1  ;;  %s26_s10 = ssub.s32 %s675_s20, %s752_s9 }
  0x11   : > { %s29_s11 = sadd.s32 1, %s671_s19  ;;  %p27_p7 = scmp.eq.s32.totalorder %s26_s10, 0 }
  0x12   : > { %461 = dma.hbm_to_vmem [thread:$0]  (!%p459_p6), %s133_s22, 512, %s135_s26, [#allocation8], %s679_s6, %s679_s6, %s680_s7  }
  0x13   : > { %464 = dma.hbm_to_vmem [thread:$0]  (!%p459_p6), %s147_s29, 512, %s149_s5, [#allocation8], %s679_s6, %s679_s6, %s680_s7  }
  0x14   : > { %p36_p8 = scmp.ne.s32.totalorder %s671_s19, %s667_s18  ;;  %p37_p9 = scmp.eq.s32.totalorder %s675_s20, 0 }
  0x15   : > { %p42_p10 = scmp.ne.s32.totalorder %s667_s18, %s663_s17  ;;  %p108_p13 = scmp.eq.s32.totalorder %s733_s23, 1 }
  0x16   : > { %s763_s12 = scalar_select %p27_p7, %s671_s19, %s29_s11  }
  0x17   : > { %p765_p11 = por %p37_p9, %p36_p8  ;;  %p771_p12 = por %p43_p1, %p42_p10 }
  0x18   : > { %p114_p0 = scmp.eq.s32.totalorder %s427_s8, 1  ;;  %p475_p2 = scmp.lt.s32.totalorder %s675_s20, 2 }
  0x19   : > { %s162_s15 = sand.u32 1, %s671_s19   ;;  %p778_p4 = por %p108_p13, %p36_p8 }
  0x1a   : > { %p782_p6 = por %p114_p0, %p42_p10  ;;  %s432_s21 = sshll.u32 %s162_s15, 3 }
  0x1b   : > { %s433_s22 = sshll.u32 %s675_s20, 3  ;;  %s166_s28 = scalar_lea.vmem [#allocation4], %s432_s21 }
  0x1c   : > { %s170_s27 = scalar_lea.hbm %s870_s1, %s433_s22  ;;  %s174_s29 = sshll.u32 %s166_s28, 4  ;;  %s175_s29 = int_to_ptr.vmem [resolvable:$true] %s174_s29 }
  0x1d   : > { %s172_s30 = sshll.u32 %s170_s27, 4  ;;  %p792_p7 = pnand %p475_p2, %p765_p11  ;;  %s173_s30 = int_to_ptr.hbm [resolvable:$true] %s172_s30 }
  0x1e   : > { %s163_s6 = scalar_lea.sflag [#allocation5], %s162_s15  ;;  %s575_s7 = sshra.s32 %s173_s30, 4  ;;  %s576_s7 = int_to_ptr.hbm [resolvable:$true] %s575_s7 }
  0x1f   : > { %s577_s8 = scalar_lea.hbm %s576_s7, 8  ;;  %p579_p9 = pneg %p792_p7 }
  0x20   : > { %p578_p8 = scmp.ne.s32.totalorder %s576_s7, %s577_s8  ;;  %s582_s21 = scalar_lea.hbm %s870_s1, 16 }
  0x21   : > { %p583_p11 = scmp.lt.s32.totalorder %s576_s7, %s870_s1  ;;  %p584_p0 = scmp.lt.s32.totalorder %s582_s21, %s577_s8 }
  0x22   : > { %p580_p10 = pnand %p579_p9, %p578_p8 }
  0x23   : > { %p585_p2 = por %p584_p0, %p583_p11 }
  0x24   : > { %p581_p13 = pneg %p580_p10 }
  0x26   : > { %p586_p5 = pnand %p585_p2, %p581_p13 }
  0x28   : > { %589 = shalt.err (!%p586_p5)
}
  0x29   : > { %468 = dma.hbm_to_vmem [thread:$0]  (!%p792_p7), %s173_s30, 128, %s175_s29, %s163_s6  }
  0x2a   : > { %183 = sbr.rel (%p738_p3) target bundleno = 319 (0x13f), region = 32  ;;  %s809_s15 = sand.u32 (!%p738_p3), 1, %s667_s18  }
  0x2b   : > { %s435_s25 = sshll.u32 (!%p738_p3), %s809_s15, 3  ;;  %s186_s26 = scalar_lea.sflag (!%p738_p3), [#allocation5], %s809_s15 }
  0x2c   : > { %s189_s27 = scalar_lea.vmem (!%p738_p3), [#allocation4], %s435_s25 }
  0x2f   : > { %650 = dma.done.wait (%p771_p12), %s186_s26, 128  }
  0x30   : > { %652 = vsyncadd (%p771_p12), %s186_s26, 4294967168 }
  0x31   : > { %654 = dma.done.wait (%p43_p1), [#allocation8], 1024  }
  0x32   : > { %656 = vsyncadd (%p43_p1), [#allocation8], 4294966272  ;;  %v229_v0 = vld [vmem:[#allocation7 + $0x18] sm:$0xff]  ;;  %v228_v1 = vld [vmem:[#allocation7 + $0x10] sm:$0xff]  ;;  %vm230_vm0 = vcmask 261120   ;;  %v255_v7 = vlaneseq  ;;  %s824_s24 = sld [smem:[#allocation3]] }
  0x33   : > { %246 = vmatpush.msra.mxu0 %v229_v0  ;;  %v281_v2 = vld [vmem:[#allocation9 + $0x18] sm:$0xff]  ;;  %v227_v3 = vld [vmem:[#allocation7 + $0x8] sm:$0xff]  ;;  %v280_v4 = vld [vmem:[#allocation9 + $0x10] sm:$0xff]  ;;  %s439_s14 = sshll.u32 %s733_s23, 3  ;;  %s222_s7 = scalar_lea.vmem [#allocation10], %s435_s25 }
  0x34   : > { %297 = vmatpush.msra.mxu1 %v281_v2  ;;  %v226_v5 = vld [vmem:[#allocation7] sm:$0xff]  ;;  %v225_v6 = vld [vmem:[%s189_s27] sm:$0xff]  ;;  %v256_v8 = vshrl.u32 %v255_v7, 7  ;;  %v257_v9 = vstv %s439_s14  ;;  %v260_v11 = vand.u32 127, %v255_v7  ;;  %v279_v18 = vld [vmem:[#allocation9 + $0x8] sm:$0xff]  ;;  %s333_s6 = scalar_lea.hbm %s873_s4, %s439_s14  ;;  %s335_s8 = sshll.u32 %s222_s7, 4  ;;  %s336_s8 = int_to_ptr.vmem [resolvable:$true] %s335_s8 }
  0x35   : > { %247 = vmatpush.msra.mxu0 %v228_v1  ;;  %v278_v20 = vld [vmem:[#allocation9] sm:$0xff]  ;;  %s337_s10 = sshll.u32 %s333_s6, 4  ;;  %s323_s11 = scalar_lea.sflag [#allocation6], %s809_s15  ;;  %s338_s10 = int_to_ptr.hbm [resolvable:$true] %s337_s10 }
  0x36   : > { %298 = vmatpush.msra.mxu1 %v280_v4  ;;  %v258_v10 = vadd.s32 %v257_v9, %v256_v8  ;;  %v265_v15 = vmul.u32 2246822519, %v260_v11  ;;  %s619_s21 = sshra.s32 %s338_s10, 4  ;;  %s625_s25 = scalar_lea.hbm %s873_s4, 16  ;;  %s620_s21 = int_to_ptr.hbm [resolvable:$true] %s619_s21 }
  0x37   : > { %248 = vmatpush.msra.mxu0 %v227_v3  ;;  %s621_s23 = scalar_lea.hbm %s620_s21, 8  ;;  %p626_p12 = scmp.lt.s32.totalorder %s620_s21, %s873_s4 }
  0x38   : > { %s261_s28 = sxor.u32 608135816, %s824_s24  ;;  %v262_v12 = vmul.u32 2654435761, %v258_v10  ;;  %299 = vmatpush.msra.mxu1 %v279_v18  ;;  %s306_s29 = sxor.u32 1013904242, %s824_s24 }
  0x39   : > { %249 = vmatpush.msra.mxu0 %v226_v5  ;;  %v263_v13 = vstv %s261_s28  ;;  %v307_v31 = vstv %s306_s29  ;;  %p622_p1 = scmp.ne.s32.totalorder %s620_s21, %s621_s23  ;;  %p627_p7 = scmp.lt.s32.totalorder %s625_s25, %s621_s23 }
  0x3a   : > { %440 = vmatmul.msk.f32.vlgmr.msra.gmra.mxu0 %vm230_vm0, %v225_v6  ;;  %v264_v14 = vadd.s32 %v263_v13, %v262_v12  ;;  %300 = vmatpush.msra.mxu1 %v278_v20  ;;  %v308_v32 = vadd.s32 %v307_v31, %v262_v12 }
  0x3b   : > { %p623_p3 = pnand %p622_p1, %p778_p4  ;;  %p628_p8 = por %p627_p7, %p626_p12 }
  0x3c   : > { %v266_v16 = vadd.s32 %v265_v15, %v264_v14  ;;  %v309_v33 = vadd.s32 %v308_v32, %v265_v15 }
  0x3d   : > { %p624_p5 = pneg %p623_p3 }
  0x3e   : > { %v267_v17 = vshrl.u32 %v266_v16, 16  ;;  %v310_v34 = vshrl.u32 %v309_v33, 16 }
  0x3f   : > { %p629_p9 = pnand %p628_p8, %p624_p5 }
  0x40   : > { %v268_v19 = vxor.u32 %v267_v17, %v266_v16  ;;  %v311_v35 = vxor.u32 %v310_v34, %v309_v33 }
  0x42   : > { %v269_v21 = vmul.u32 2246822507, %v268_v19  ;;  %v312_v36 = vmul.u32 2246822507, %v311_v35 }
  0x44   : > { %v270_v22 = vshrl.u32 %v269_v21, 13  ;;  %v313_v37 = vshrl.u32 %v312_v36, 13 }
  0x46   : > { %v271_v23 = vxor.u32 %v270_v22, %v269_v21  ;;  %v314_v38 = vxor.u32 %v313_v37, %v312_v36 }
  0x48   : > { %v272_v24 = vmul.u32 3266489909, %v271_v23  ;;  %v315_v39 = vmul.u32 3266489909, %v314_v38 }
  0x4a   : > { %v273_v25 = vshrl.u32 %v272_v24, 16  ;;  %v316_v40 = vshrl.u32 %v315_v39, 16 }
  0x4c   : > { %v274_v26 = vxor.u32 %v273_v25, %v272_v24  ;;  %v317_v41 = vxor.u32 %v316_v40, %v315_v39 }
  0x4e   : > { %v275_v27 = vand.u32 2147483648, %v274_v26  ;;  %v318_v42 = vand.u32 2147483648, %v317_v41 }
  0x50   : > { %vm276_vm1 = vcmp.eq.s32.totalorder %v275_v27, 0  ;;  %vm319_vm2 = vcmp.eq.s32.totalorder %v318_v42, 0 }
  0xb7   : > { %v251_v28 = vpop.f32.mrf.mxu0 }
  0xb8   : > { %v254_v29 = vmax.f32 %v251_v28, 0.0 }
  0xba   : > { %v277_v30 = vsel %vm276_vm1, %v254_v29, 0.0 }
  0xbb   : > { %441 = vmatmul.msk.f32.vlgmr.msra.gmra.mxu1 %vm230_vm0, %v277_v30 }
 0x138   : > { %v302_v43 = vpop.f32.mrf.mxu1 }
 0x139   : > { %v305_v44 = vmax.f32 %v302_v43, 0.0 }
 0x13b   : > { %v320_v45 = vsel %vm319_vm2, %v305_v44, 0.0 }
 0x13c   : > { %321 = vst.msk [vmem:[%s222_s7] sm:$0xff] %vm230_vm0, %v320_v45 }
 0x13d   : > { %632 = shalt.err (!%p629_p9)
}
 0x13e   : > { %456 = dma.vmem_to_hbm [thread:$0]  (%p778_p4), %s336_s8, 128, %s338_s10, %s323_s11  }
 0x13f PF: > { %s349_s15 = sand.u32 1, %s663_s17   ;;  %p880_p10 = scmp.ge.s32.totalorder %s675_s20, 2 }
 0x140   : > { %s350_s24 = scalar_lea.sflag [#allocation6], %s349_s15 }
 0x141   : > { %p470_p13 = pnand %p880_p10, %p782_p6 }
 0x143   : > { %p471_p11 = pneg %p470_p13 }
 0x145   : > { %658 = dma.done.wait (%p471_p11), %s350_s24, 128  }
 0x146   : > { %660 = vsyncadd (%p471_p11), %s350_s24, 4294967168  ;;  %p19_p0 = scmp.ge.s32.totalorder %s752_s9, 4   ;;  %s881_s17 = smov %s667_s18 }
 0x147   : > { %s882_s18 = smov %s671_s19  ;;  %s883_s19 = smov %s763_s12 }
 0x148   : > { %s884_s20 = smov %s752_s9  ;;  %21 = sbr.rel (!%p19_p0) target bundleno = 8 (0x8), region = 85 }
 0x14d   :  { %356 = vsyncpa [#allocation5], 1 }
 0x14e   :  { %358 = vsyncpa [#allocation5 + $0x1], 1 }
 0x14f   :  { %359 = vsyncpa [#allocation8], 1 }
 0x150   :  { %360 = vsyncpa [#allocation6], 1 }
 0x151   :  { %362 = vsyncpa [#allocation6 + $0x1], 1 }

</bundles_post_ra>
